<compile_context>
chip_gen: v7x
topology: tpu7x:2x2x1
jax: 0.10.0
libtpu: 0.0.40
codegen_flags: <defaults>
</compile_context>

<pallas_src>
import math

import jax
import jax.numpy as jnp
from jax.experimental import pallas as pl
from jax.experimental.pallas import tpu as pltpu


VMEM_LIMIT_BYTES = 32 * 1024 * 1024  # fits v7x's 64 MiB as well as v5e/v6e
_HI = jax.lax.Precision.HIGHEST      # reference-path precision only


# ----------------------------------------------------------------------------
# Activations (DynamicNN takes `activation_fn`; we use ReLU, i.e. F.relu).
# ----------------------------------------------------------------------------
def relu(x):
    return jnp.maximum(x, 0.0)


# ----------------------------------------------------------------------------
# Fused LSTM (+ optional trailing run of nn.Linear layers) -- one pallas_call.
# Prepared gate column order is [i | f | o | g] (PyTorch stores [i, f, g, o]).
# ----------------------------------------------------------------------------
def make_lstm_mlp_kernel(T, B, H, n_lin, lin_act_flags, act):
    def kernel(x_ref, wih_ref, whh_ref, b_ref, *refs):
        o_ref = refs[-1]
        # Hoisted input projection: one MXU pass over all T*B rows.
        xg = jnp.dot(x_ref[...], wih_ref[...],
                     preferred_element_type=jnp.float32)          # (B*T, 4H)
        xg = xg.reshape(B, T, 4 * H)                               # b-major rows
        whh = whh_ref[...]
        bias = b_ref[...]                                          # (1, 4H)
        h = jnp.zeros((B, H), jnp.float32)
        c = jnp.zeros((B, H), jnp.float32)
        for t in range(T):                                         # static unroll
            gates = xg[:, t, :] + bias + jnp.dot(
                h, whh, preferred_element_type=jnp.float32)        # (B, 4H)
            sg = jax.nn.sigmoid(gates[:, :3 * H])                  # i, f, o only
            gg = jnp.tanh(gates[:, 3 * H:])                        # g only
            i_g = sg[:, 0:H]
            f_g = sg[:, H:2 * H]
            o_g = sg[:, 2 * H:3 * H]
            c = f_g * c + i_g * gg
            h = o_g * jnp.tanh(c)
        # TODO(synk): lay gates out (4, B, H) (sublane-grouped) so the four
        # extracts fall on vreg boundaries; skipped at these tiny shapes.
        y = h
        for li in range(n_lin):                                    # MLP epilogue
            w = refs[2 * li][...]
            bb = refs[2 * li + 1][...]
            y = jnp.dot(y, w, preferred_element_type=jnp.float32) + bb
            if lin_act_flags[li]:
                y = act(y)
        o_ref[...] = y
    return kernel


def lstm_mlp_pallas(x, lstm_p, lin_wbs, lin_act_flags, act):
    """x: (B, T, I).  lstm_p: (W_ih^T (I,4H), W_hh^T (H,4H), bias (1,4H)) with
    gate columns reordered [i,f,o,g].  lin_wbs: list of (W^T, bias) layers."""
    B, T, I = x.shape
    wih, whh, b = lstm_p
    H = whh.shape[0]
    x2 = x.reshape(B * T, I)            # free reshape (merge leading dims)
    fout = lin_wbs[-1][0].shape[1] if lin_wbs else H
    args = [x2, wih, whh, b]
    for (w, bb) in lin_wbs:
        args += [w, bb]
    # TODO(synk): for large B, split the batch over a "parallel" grid axis so
    # v7x's two TensorCores share the recurrence; single launch is best at B=2.
    return pl.pallas_call(
        make_lstm_mlp_kernel(T, B, H, len(lin_wbs), tuple(lin_act_flags), act),
        out_shape=jax.ShapeDtypeStruct((B, fout), jnp.float32),
        in_specs=[pl.BlockSpec(memory_space=pltpu.MemorySpace.VMEM)] * len(args),
        out_specs=pl.BlockSpec(memory_space=pltpu.MemorySpace.VMEM),
        compiler_params=pltpu.CompilerParams(vmem_limit_bytes=VMEM_LIMIT_BYTES),
    )(*args)


# ----------------------------------------------------------------------------
# Fused run of nn.Conv2d(3x3, s=1, p=1) layers -- one pallas_call.
# Activations live in VMEM as (C, B*H*W): channels on sublanes, batch folded
# into the lane dimension.  Taps are lane rolls + border masks; each layer is
# 9 accumulated (Cout, Cin) @ (Cin, B*H*W) MXU matmuls.
# ----------------------------------------------------------------------------
def _lane_roll(a, off, n):
    """out[:, j] = a[:, (j + off) % n]   (static off, explicit slice+concat)."""
    s = off % n
    if s == 0:
        return a
    return jnp.concatenate([a[:, s:], a[:, :s]], axis=1)


def make_conv_run_kernel(n_layers, act_flags, act, B, H, W):
    BHW = B * H * W

    def kernel(x_ref, *refs):
        o_ref = refs[-1]
        # Per-tap validity masks (shared by every conv layer of the run).
        col = jax.lax.broadcasted_iota(jnp.int32, (1, BHW), 1)
        xs = col % W
        ys = (col // W) % H
        taps = []
        for dy in range(3):
            for dx in range(3):
                off = (dy - 1) * W + (dx - 1)
                m = ((xs + (dx - 1) >= 0) & (xs + (dx - 1) < W) &
                     (ys + (dy - 1) >= 0) & (ys + (dy - 1) < H))
                taps.append((off, m))
        a = x_ref[...]                                    # (Cin0, B*H*W)
        for li in range(n_layers):
            w9 = refs[2 * li][...]                        # (9, Cout, Cin)
            bias = refs[2 * li + 1][...]                  # (Cout, 1)
            cout = w9.shape[1]
            acc = jnp.zeros((cout, BHW), jnp.float32)
            for k, (off, m) in enumerate(taps):           # k == dy*3 + dx
                tap = jnp.where(m, _lane_roll(a, off, BHW), 0.0)
                acc = acc + jnp.dot(w9[k], tap,
                                    preferred_element_type=jnp.float32)
            acc = acc + bias
            if act_flags[li]:
                acc = act(acc)
            a = acc                                       # stays in VMEM
        o_ref[...] = a
    return kernel


def conv_run_pallas(x_nchw, conv_params, act_flags, act):
    """Fused run of 3x3/s1/p1 convs; NCHW in, NCHW out; one kernel launch."""
    B, Cin, H, W = x_nchw.shape
    BHW = B * H * W
    x2 = jnp.transpose(x_nchw, (1, 0, 2, 3)).reshape(Cin, BHW)
    cout_last = conv_params[-1][0].shape[1]
    args = [x2]
    for (w9, b2) in conv_params:
        args += [w9, b2]
    # TODO(synk): tile B*H*W across a "parallel" grid axis for large images so
    # v7x's second TensorCore is used; one launch is best at B*H*W = 512.
    out = pl.pallas_call(
        make_conv_run_kernel(len(conv_params), tuple(act_flags), act, B, H, W),
        out_shape=jax.ShapeDtypeStruct((cout_last, BHW), jnp.float32),
        in_specs=[pl.BlockSpec(memory_space=pltpu.MemorySpace.VMEM)] * len(args),
        out_specs=pl.BlockSpec(memory_space=pltpu.MemorySpace.VMEM),
        compiler_params=pltpu.CompilerParams(vmem_limit_bytes=VMEM_LIMIT_BYTES),
    )(*args)
    return jnp.transpose(out.reshape(cout_last, B, H, W), (1, 0, 2, 3))


# ----------------------------------------------------------------------------
# Fused run of nn.Linear layers (used when a linear run does not follow an
# LSTM).  One pallas_call; intermediates stay in VMEM; M-tiled parallel grid.
# ----------------------------------------------------------------------------
def make_mlp_kernel(n_layers, act_flags, act):
    def kernel(x_ref, *refs):
        o_ref = refs[-1]
        y = x_ref[...]
        for li in range(n_layers):
            w = refs[2 * li][...]
            b = refs[2 * li + 1][...]
            y = jnp.dot(y, w, preferred_element_type=jnp.float32) + b
            if act_flags[li]:
                y = act(y)
        o_ref[...] = y
    return kernel


def mlp_pallas(x, wbs, act_flags, act):
    """wbs: list of (W^T (fin, fout), bias (1, fout)) in kernel-ready layout."""
    lead = x.shape[:-1]
    fin = x.shape[-1]
    x2 = x.reshape(-1, fin)
    m = x2.shape[0]
    fout = wbs[-1][0].shape[1]
    if m <= 512:
        tm, m_pad = m, m
    else:
        tm = 512
        m_pad = ((m + tm - 1) // tm) * tm
        if m_pad != m:
            x2 = jnp.pad(x2, ((0, m_pad - m), (0, 0)))

    args = []
    in_specs = [pl.BlockSpec((tm, fin), lambda i: (i, 0))]
    for (w, b) in wbs:
        args += [w, b]
        in_specs.append(pl.BlockSpec(w.shape, lambda i: (0, 0)))
        in_specs.append(pl.BlockSpec(b.shape, lambda i: (0, 0)))

    out = pl.pallas_call(
        make_mlp_kernel(len(wbs), tuple(act_flags), act),
        out_shape=jax.ShapeDtypeStruct((m_pad, fout), jnp.float32),
        grid=(m_pad // tm,),
        in_specs=in_specs,
        out_specs=pl.BlockSpec((tm, fout), lambda i: (i, 0)),
        compiler_params=pltpu.CompilerParams(
            dimension_semantics=("parallel",),
            vmem_limit_bytes=VMEM_LIMIT_BYTES),
    )(x2, *args)
    return out[:m].reshape(*lead, fout)


# ----------------------------------------------------------------------------
# DynamicNN equivalent: deterministic init (PyTorch layouts), one-time param
# preparation into kernel layouts, and forward dispatch with segment fusion.
# ----------------------------------------------------------------------------
def init_params(key, layers, layer_types):
    """Deterministic parameter init mirroring the PyTorch module's shapes."""
    params = []
    for i, lt in enumerate(layer_types):
        fin, fout = layers[i], layers[i + 1]
        key, k0, k1, k2, k3 = jax.random.split(key, 5)
        if lt == 'linear':
            bound = 1.0 / math.sqrt(fin)
            w = jax.random.uniform(k0, (fout, fin), jnp.float32, -bound, bound)
            b = jax.random.uniform(k1, (fout,), jnp.float32, -bound, bound)
            params.append((w, b))
        elif lt == 'conv2d':
            bound = 1.0 / math.sqrt(fin * 9)
            w = jax.random.uniform(k0, (fout, fin, 3, 3), jnp.float32, -bound, bound)
            b = jax.random.uniform(k1, (fout,), jnp.float32, -bound, bound)
            params.append((w, b))
        elif lt == 'lstm':
            bound = 1.0 / math.sqrt(fout)
            w_ih = jax.random.uniform(k0, (4 * fout, fin), jnp.float32, -bound, bound)
            w_hh = jax.random.uniform(k1, (4 * fout, fout), jnp.float32, -bound, bound)
            b_ih = jax.random.uniform(k2, (4 * fout,), jnp.float32, -bound, bound)
            b_hh = jax.random.uniform(k3, (4 * fout,), jnp.float32, -bound, bound)
            params.append((w_ih, w_hh, b_ih, b_hh))
        else:
            raise ValueError(f'Unknown layer type: {lt}')
    return params


def prepare_params(params, layer_types):
    """One-time conversion to kernel-ready layouts (done outside the forward)."""
    prepared = []
    for p, lt in zip(params, layer_types):
        if lt == 'linear':
            w, b = p
            prepared.append((w.T, b.reshape(1, -1)))                # (fin,fout), (1,fout)
        elif lt == 'conv2d':
            w, b = p
            cout, cin = w.shape[0], w.shape[1]
            w9 = jnp.transpose(w, (2, 3, 0, 1)).reshape(9, cout, cin)  # k = ky*3+kx
            prepared.append((w9, b.reshape(cout, 1)))
        elif lt == 'lstm':
            w_ih, w_hh, b_ih, b_hh = p
            hh = w_hh.shape[1]

            def reord(a, H=hh):   # rows [i,f,g,o] -> [i,f,o,g]
                return jnp.concatenate(
                    [a[0:H], a[H:2 * H], a[3 * H:4 * H], a[2 * H:3 * H]], axis=0)

            prepared.append((reord(w_ih).T,                          # (I, 4H)
                             reord(w_hh).T,                          # (H, 4H)
                             reord(b_ih + b_hh).reshape(1, -1)))     # (1, 4H)
        else:
            raise ValueError(f'Unknown layer type: {lt}')
    return prepared


def dynamic_nn_forward(prepared, layer_types, x, activation_fn):
    """Pallas-backed equivalent of DynamicNN.forward (one launch per segment)."""
    n = len(layer_types)
    i = 0
    while i < n:
        lt = layer_types[i]
        if lt == 'conv2d':
            j = i
            while j < n and layer_types[j] == 'conv2d':
                j += 1
            x = conv_run_pallas(x, [prepared[k] for k in range(i, j)],
                                [k < n - 1 for k in range(i, j)], activation_fn)
            i = j
        elif lt == 'lstm':
            # Fuse the LSTM with the immediately-following linear run.
            j = i + 1
            while j < n and layer_types[j] == 'linear':
                j += 1
            x = lstm_mlp_pallas(x, prepared[i],
                                [prepared[k] for k in range(i + 1, j)],
                                [k < n - 1 for k in range(i + 1, j)],
                                activation_fn)
            i = j
        elif lt == 'linear':
            j = i
            while j < n and layer_types[j] == 'linear':
                j += 1
            x = mlp_pallas(x, [prepared[k] for k in range(i, j)],
                           [k < n - 1 for k in range(i, j)], activation_fn)
            i = j
        else:
            raise ValueError(f'Unknown layer type: {lt}')
    return x


# ----------------------------------------------------------------------------
# Pure-JAX reference (for tolerance check only; mirrors the PyTorch module).
# ----------------------------------------------------------------------------
def dynamic_nn_ref(params, layer_types, x, activation_fn):
    n = len(layer_types)
    for i, lt in enumerate(layer_types):
        if lt == 'lstm':
            w_ih, w_hh, b_ih, b_hh = params[i]
            B, T, _ = x.shape
            H = w_hh.shape[1]
            h = jnp.zeros((B, H), jnp.float32)
            c = jnp.zeros((B, H), jnp.float32)
            for t in range(T):
                g = (jnp.dot(x[:, t, :], w_ih.T, precision=_HI)
                     + jnp.dot(h, w_hh.T, precision=_HI) + b_ih + b_hh)
                i_g = jax.nn.sigmoid(g[:, 0:H])
                f_g = jax.nn.sigmoid(g[:, H:2 * H])
                g_g = jnp.tanh(g[:, 2 * H:3 * H])
                o_g = jax.nn.sigmoid(g[:, 3 * H:4 * H])
                c = f_g * c + i_g * g_g
                h = o_g * jnp.tanh(c)
            x = h
        elif lt == 'linear':
            w, b = params[i]
            x = jnp.dot(x, w.T, precision=_HI) + b
            if i < n - 1:
                x = activation_fn(x)
        elif lt == 'conv2d':
            w, b = params[i]
            y = jax.lax.conv_general_dilated(
                x, w, window_strides=(1, 1), padding=((1, 1), (1, 1)),
                dimension_numbers=('NCHW', 'OIHW', 'NCHW'), precision=_HI)
            x = y + b.reshape(1, -1, 1, 1)
            if i < n - 1:
                x = activation_fn(x)
        else:
            raise ValueError(f'Unknown layer type: {lt}')
    return x


if __name__ == "__main__":
    key = jax.random.PRNGKey(0)
    ka, kxa, kb, kxb, kc, kxc = jax.random.split(key, 6)

    # Config A: DynamicNN([16, 32, 24, 8], ['lstm', 'linear', 'linear'], F.relu)
    layers_a = [16, 32, 24, 8]
    types_a = ['lstm', 'linear', 'linear']
    params_a = init_params(ka, layers_a, types_a)
    prep_a = prepare_params(params_a, types_a)
    x_lstm = jax.random.normal(kxa, (2, 8, 16), jnp.float32)     # (batch, seq, feat)
    out_a = dynamic_nn_forward(prep_a, types_a, x_lstm, relu)
    ref_a = dynamic_nn_ref(params_a, types_a, x_lstm, relu)
    assert out_a.shape == (2, 8)
    assert jnp.allclose(out_a, ref_a, rtol=2e-4, atol=2e-4)

    # Config B: DynamicNN([4, 8, 6], ['conv2d', 'conv2d'], F.relu)
    layers_b = [4, 8, 6]
    types_b = ['conv2d', 'conv2d']
    params_b = init_params(kb, layers_b, types_b)
    prep_b = prepare_params(params_b, types_b)
    x_conv = jax.random.normal(kxb, (2, 4, 16, 16), jnp.float32)  # NCHW
    out_b = dynamic_nn_forward(prep_b, types_b, x_conv, relu)
    ref_b = dynamic_nn_ref(params_b, types_b, x_conv, relu)
    assert out_b.shape == (2, 6, 16, 16)
    assert jnp.allclose(out_b, ref_b, rtol=2e-4, atol=2e-4)

    # Config C: pure-linear stack (exercises the standalone fused-MLP path).
    layers_c = [16, 64, 32, 10]
    types_c = ['linear', 'linear', 'linear']
    params_c = init_params(kc, layers_c, types_c)
    prep_c = prepare_params(params_c, types_c)
    x_lin = jax.random.normal(kxc, (2, 16), jnp.float32)
    out_c = dynamic_nn_forward(prep_c, types_c, x_lin, relu)
    ref_c = dynamic_nn_ref(params_c, types_c, x_lin, relu)
    assert out_c.shape == (2, 10)
    assert jnp.allclose(out_c, ref_c, rtol=2e-4, atol=2e-4)

    jax.block_until_ready((out_a, out_b, out_c))
    print("KERNEL_OK")
</pallas_src>

<mosaic_0001>
module attributes {stable_mosaic.version = 11 : i64} {
  func.func @kernel(%arg0: memref<16x16xf32, #tpu.memory_space<vmem>>, %arg1: memref<16x128xf32, #tpu.memory_space<vmem>>, %arg2: memref<32x128xf32, #tpu.memory_space<vmem>>, %arg3: memref<1x128xf32, #tpu.memory_space<vmem>>, %arg4: memref<32x24xf32, #tpu.memory_space<vmem>>, %arg5: memref<1x24xf32, #tpu.memory_space<vmem>>, %arg6: memref<24x8xf32, #tpu.memory_space<vmem>>, %arg7: memref<1x8xf32, #tpu.memory_space<vmem>>, %arg8: memref<2x8xf32, #tpu.memory_space<vmem>>) attributes {dimension_semantics = [], scalar_prefetch = 0 : i64, scratch_operands = 0 : i64, tpu.core_type = #tpu.core_type<tc>} {
    %c0 = arith.constant 0 : index
    %c0_0 = arith.constant 0 : index
    %0 = vector.load %arg0[%c0, %c0_0] : memref<16x16xf32, #tpu.memory_space<vmem>>, vector<16x16xf32>
    %c0_1 = arith.constant 0 : index
    %c0_2 = arith.constant 0 : index
    %1 = vector.load %arg1[%c0_1, %c0_2] : memref<16x128xf32, #tpu.memory_space<vmem>>, vector<16x128xf32>
    %cst = arith.constant dense<0.000000e+00> : vector<16x128xf32>
    %2 = tpu.matmul %0, %1, %cst {dimension_numbers = #tpu.dot_dimension_numbers<[1], [0], [0], [1], [0, 0, 1, 1], [], []>} : vector<16x16xf32>, vector<16x128xf32>, vector<16x128xf32> -> vector<16x128xf32>
    %3 = vector.shape_cast %2 : vector<16x128xf32> to vector<2x8x128xf32>
    %c0_3 = arith.constant 0 : index
    %c0_4 = arith.constant 0 : index
    %4 = vector.load %arg2[%c0_3, %c0_4] : memref<32x128xf32, #tpu.memory_space<vmem>>, vector<32x128xf32>
    %c0_5 = arith.constant 0 : index
    %c0_6 = arith.constant 0 : index
    %5 = vector.load %arg3[%c0_5, %c0_6] : memref<1x128xf32, #tpu.memory_space<vmem>>, vector<1x128xf32>
    %cst_7 = arith.constant 0.000000e+00 : f32
    %6 = vector.broadcast %cst_7 : f32 to vector<2x32xf32>
    %cst_8 = arith.constant 0.000000e+00 : f32
    %7 = vector.broadcast %cst_8 : f32 to vector<2x32xf32>
    %8 = vector.extract_strided_slice %3 {offsets = [0, 0, 0], sizes = [2, 1, 128], strides = [1, 1, 1]} : vector<2x8x128xf32> to vector<2x1x128xf32>
    %9 = vector.shape_cast %8 : vector<2x1x128xf32> to vector<2x128xf32>
    %10 = vector.broadcast %5 : vector<1x128xf32> to vector<2x128xf32>
    %11 = arith.addf %9, %10 : vector<2x128xf32>
    %cst_9 = arith.constant dense<0.000000e+00> : vector<2x128xf32>
    %12 = tpu.matmul %6, %4, %cst_9 {dimension_numbers = #tpu.dot_dimension_numbers<[1], [0], [0], [1], [0, 0, 1, 1], [], []>} : vector<2x32xf32>, vector<32x128xf32>, vector<2x128xf32> -> vector<2x128xf32>
    %13 = arith.addf %11, %12 : vector<2x128xf32>
    %14 = vector.extract_strided_slice %13 {offsets = [0, 0], sizes = [2, 96], strides = [1, 1]} : vector<2x128xf32> to vector<2x96xf32>
    %15 = arith.negf %14 : vector<2x96xf32>
    %16 = math.exp %15 : vector<2x96xf32>
    %cst_10 = arith.constant 1.000000e+00 : f32
    %17 = vector.broadcast %cst_10 : f32 to vector<2x96xf32>
    %18 = arith.addf %17, %16 : vector<2x96xf32>
    %19 = arith.divf %17, %18 : vector<2x96xf32>
    %20 = vector.extract_strided_slice %13 {offsets = [0, 96], sizes = [2, 32], strides = [1, 1]} : vector<2x128xf32> to vector<2x32xf32>
    %21 = math.tanh %20 : vector<2x32xf32>
    %22 = vector.extract_strided_slice %19 {offsets = [0, 0], sizes = [2, 32], strides = [1, 1]} : vector<2x96xf32> to vector<2x32xf32>
    %23 = vector.extract_strided_slice %19 {offsets = [0, 32], sizes = [2, 32], strides = [1, 1]} : vector<2x96xf32> to vector<2x32xf32>
    %24 = vector.extract_strided_slice %19 {offsets = [0, 64], sizes = [2, 32], strides = [1, 1]} : vector<2x96xf32> to vector<2x32xf32>
    %25 = arith.mulf %23, %7 : vector<2x32xf32>
    %26 = arith.mulf %22, %21 : vector<2x32xf32>
    %27 = arith.addf %25, %26 : vector<2x32xf32>
    %28 = math.tanh %27 : vector<2x32xf32>
    %29 = arith.mulf %24, %28 : vector<2x32xf32>
    %30 = vector.extract_strided_slice %3 {offsets = [0, 1, 0], sizes = [2, 1, 128], strides = [1, 1, 1]} : vector<2x8x128xf32> to vector<2x1x128xf32>
    %31 = vector.shape_cast %30 : vector<2x1x128xf32> to vector<2x128xf32>
    %32 = vector.broadcast %5 : vector<1x128xf32> to vector<2x128xf32>
    %33 = arith.addf %31, %32 : vector<2x128xf32>
    %cst_11 = arith.constant dense<0.000000e+00> : vector<2x128xf32>
    %34 = tpu.matmul %29, %4, %cst_11 {dimension_numbers = #tpu.dot_dimension_numbers<[1], [0], [0], [1], [0, 0, 1, 1], [], []>} : vector<2x32xf32>, vector<32x128xf32>, vector<2x128xf32> -> vector<2x128xf32>
    %35 = arith.addf %33, %34 : vector<2x128xf32>
    %36 = vector.extract_strided_slice %35 {offsets = [0, 0], sizes = [2, 96], strides = [1, 1]} : vector<2x128xf32> to vector<2x96xf32>
    %37 = arith.negf %36 : vector<2x96xf32>
    %38 = math.exp %37 : vector<2x96xf32>
    %cst_12 = arith.constant 1.000000e+00 : f32
    %39 = vector.broadcast %cst_12 : f32 to vector<2x96xf32>
    %40 = arith.addf %39, %38 : vector<2x96xf32>
    %41 = arith.divf %39, %40 : vector<2x96xf32>
    %42 = vector.extract_strided_slice %35 {offsets = [0, 96], sizes = [2, 32], strides = [1, 1]} : vector<2x128xf32> to vector<2x32xf32>
    %43 = math.tanh %42 : vector<2x32xf32>
    %44 = vector.extract_strided_slice %41 {offsets = [0, 0], sizes = [2, 32], strides = [1, 1]} : vector<2x96xf32> to vector<2x32xf32>
    %45 = vector.extract_strided_slice %41 {offsets = [0, 32], sizes = [2, 32], strides = [1, 1]} : vector<2x96xf32> to vector<2x32xf32>
    %46 = vector.extract_strided_slice %41 {offsets = [0, 64], sizes = [2, 32], strides = [1, 1]} : vector<2x96xf32> to vector<2x32xf32>
    %47 = arith.mulf %45, %27 : vector<2x32xf32>
    %48 = arith.mulf %44, %43 : vector<2x32xf32>
    %49 = arith.addf %47, %48 : vector<2x32xf32>
    %50 = math.tanh %49 : vector<2x32xf32>
    %51 = arith.mulf %46, %50 : vector<2x32xf32>
    %52 = vector.extract_strided_slice %3 {offsets = [0, 2, 0], sizes = [2, 1, 128], strides = [1, 1, 1]} : vector<2x8x128xf32> to vector<2x1x128xf32>
    %53 = vector.shape_cast %52 : vector<2x1x128xf32> to vector<2x128xf32>
    %54 = vector.broadcast %5 : vector<1x128xf32> to vector<2x128xf32>
    %55 = arith.addf %53, %54 : vector<2x128xf32>
    %cst_13 = arith.constant dense<0.000000e+00> : vector<2x128xf32>
    %56 = tpu.matmul %51, %4, %cst_13 {dimension_numbers = #tpu.dot_dimension_numbers<[1], [0], [0], [1], [0, 0, 1, 1], [], []>} : vector<2x32xf32>, vector<32x128xf32>, vector<2x128xf32> -> vector<2x128xf32>
    %57 = arith.addf %55, %56 : vector<2x128xf32>
    %58 = vector.extract_strided_slice %57 {offsets = [0, 0], sizes = [2, 96], strides = [1, 1]} : vector<2x128xf32> to vector<2x96xf32>
    %59 = arith.negf %58 : vector<2x96xf32>
    %60 = math.exp %59 : vector<2x96xf32>
    %cst_14 = arith.constant 1.000000e+00 : f32
    %61 = vector.broadcast %cst_14 : f32 to vector<2x96xf32>
    %62 = arith.addf %61, %60 : vector<2x96xf32>
    %63 = arith.divf %61, %62 : vector<2x96xf32>
    %64 = vector.extract_strided_slice %57 {offsets = [0, 96], sizes = [2, 32], strides = [1, 1]} : vector<2x128xf32> to vector<2x32xf32>
    %65 = math.tanh %64 : vector<2x32xf32>
    %66 = vector.extract_strided_slice %63 {offsets = [0, 0], sizes = [2, 32], strides = [1, 1]} : vector<2x96xf32> to vector<2x32xf32>
    %67 = vector.extract_strided_slice %63 {offsets = [0, 32], sizes = [2, 32], strides = [1, 1]} : vector<2x96xf32> to vector<2x32xf32>
    %68 = vector.extract_strided_slice %63 {offsets = [0, 64], sizes = [2, 32], strides = [1, 1]} : vector<2x96xf32> to vector<2x32xf32>
    %69 = arith.mulf %67, %49 : vector<2x32xf32>
    %70 = arith.mulf %66, %65 : vector<2x32xf32>
    %71 = arith.addf %69, %70 : vector<2x32xf32>
    %72 = math.tanh %71 : vector<2x32xf32>
    %73 = arith.mulf %68, %72 : vector<2x32xf32>
    %74 = vector.extract_strided_slice %3 {offsets = [0, 3, 0], sizes = [2, 1, 128], strides = [1, 1, 1]} : vector<2x8x128xf32> to vector<2x1x128xf32>
    %75 = vector.shape_cast %74 : vector<2x1x128xf32> to vector<2x128xf32>
    %76 = vector.broadcast %5 : vector<1x128xf32> to vector<2x128xf32>
    %77 = arith.addf %75, %76 : vector<2x128xf32>
    %cst_15 = arith.constant dense<0.000000e+00> : vector<2x128xf32>
    %78 = tpu.matmul %73, %4, %cst_15 {dimension_numbers = #tpu.dot_dimension_numbers<[1], [0], [0], [1], [0, 0, 1, 1], [], []>} : vector<2x32xf32>, vector<32x128xf32>, vector<2x128xf32> -> vector<2x128xf32>
    %79 = arith.addf %77, %78 : vector<2x128xf32>
    %80 = vector.extract_strided_slice %79 {offsets = [0, 0], sizes = [2, 96], strides = [1, 1]} : vector<2x128xf32> to vector<2x96xf32>
    %81 = arith.negf %80 : vector<2x96xf32>
    %82 = math.exp %81 : vector<2x96xf32>
    %cst_16 = arith.constant 1.000000e+00 : f32
    %83 = vector.broadcast %cst_16 : f32 to vector<2x96xf32>
    %84 = arith.addf %83, %82 : vector<2x96xf32>
    %85 = arith.divf %83, %84 : vector<2x96xf32>
    %86 = vector.extract_strided_slice %79 {offsets = [0, 96], sizes = [2, 32], strides = [1, 1]} : vector<2x128xf32> to vector<2x32xf32>
    %87 = math.tanh %86 : vector<2x32xf32>
    %88 = vector.extract_strided_slice %85 {offsets = [0, 0], sizes = [2, 32], strides = [1, 1]} : vector<2x96xf32> to vector<2x32xf32>
    %89 = vector.extract_strided_slice %85 {offsets = [0, 32], sizes = [2, 32], strides = [1, 1]} : vector<2x96xf32> to vector<2x32xf32>
    %90 = vector.extract_strided_slice %85 {offsets = [0, 64], sizes = [2, 32], strides = [1, 1]} : vector<2x96xf32> to vector<2x32xf32>
    %91 = arith.mulf %89, %71 : vector<2x32xf32>
    %92 = arith.mulf %88, %87 : vector<2x32xf32>
    %93 = arith.addf %91, %92 : vector<2x32xf32>
    %94 = math.tanh %93 : vector<2x32xf32>
    %95 = arith.mulf %90, %94 : vector<2x32xf32>
    %96 = vector.extract_strided_slice %3 {offsets = [0, 4, 0], sizes = [2, 1, 128], strides = [1, 1, 1]} : vector<2x8x128xf32> to vector<2x1x128xf32>
    %97 = vector.shape_cast %96 : vector<2x1x128xf32> to vector<2x128xf32>
    %98 = vector.broadcast %5 : vector<1x128xf32> to vector<2x128xf32>
    %99 = arith.addf %97, %98 : vector<2x128xf32>
    %cst_17 = arith.constant dense<0.000000e+00> : vector<2x128xf32>
    %100 = tpu.matmul %95, %4, %cst_17 {dimension_numbers = #tpu.dot_dimension_numbers<[1], [0], [0], [1], [0, 0, 1, 1], [], []>} : vector<2x32xf32>, vector<32x128xf32>, vector<2x128xf32> -> vector<2x128xf32>
    %101 = arith.addf %99, %100 : vector<2x128xf32>
    %102 = vector.extract_strided_slice %101 {offsets = [0, 0], sizes = [2, 96], strides = [1, 1]} : vector<2x128xf32> to vector<2x96xf32>
    %103 = arith.negf %102 : vector<2x96xf32>
    %104 = math.exp %103 : vector<2x96xf32>
    %cst_18 = arith.constant 1.000000e+00 : f32
    %105 = vector.broadcast %cst_18 : f32 to vector<2x96xf32>
    %106 = arith.addf %105, %104 : vector<2x96xf32>
    %107 = arith.divf %105, %106 : vector<2x96xf32>
    %108 = vector.extract_strided_slice %101 {offsets = [0, 96], sizes = [2, 32], strides = [1, 1]} : vector<2x128xf32> to vector<2x32xf32>
    %109 = math.tanh %108 : vector<2x32xf32>
    %110 = vector.extract_strided_slice %107 {offsets = [0, 0], sizes = [2, 32], strides = [1, 1]} : vector<2x96xf32> to vector<2x32xf32>
    %111 = vector.extract_strided_slice %107 {offsets = [0, 32], sizes = [2, 32], strides = [1, 1]} : vector<2x96xf32> to vector<2x32xf32>
    %112 = vector.extract_strided_slice %107 {offsets = [0, 64], sizes = [2, 32], strides = [1, 1]} : vector<2x96xf32> to vector<2x32xf32>
    %113 = arith.mulf %111, %93 : vector<2x32xf32>
    %114 = arith.mulf %110, %109 : vector<2x32xf32>
    %115 = arith.addf %113, %114 : vector<2x32xf32>
    %116 = math.tanh %115 : vector<2x32xf32>
    %117 = arith.mulf %112, %116 : vector<2x32xf32>
    %118 = vector.extract_strided_slice %3 {offsets = [0, 5, 0], sizes = [2, 1, 128], strides = [1, 1, 1]} : vector<2x8x128xf32> to vector<2x1x128xf32>
    %119 = vector.shape_cast %118 : vector<2x1x128xf32> to vector<2x128xf32>
    %120 = vector.broadcast %5 : vector<1x128xf32> to vector<2x128xf32>
    %121 = arith.addf %119, %120 : vector<2x128xf32>
    %cst_19 = arith.constant dense<0.000000e+00> : vector<2x128xf32>
    %122 = tpu.matmul %117, %4, %cst_19 {dimension_numbers = #tpu.dot_dimension_numbers<[1], [0], [0], [1], [0, 0, 1, 1], [], []>} : vector<2x32xf32>, vector<32x128xf32>, vector<2x128xf32> -> vector<2x128xf32>
    %123 = arith.addf %121, %122 : vector<2x128xf32>
    %124 = vector.extract_strided_slice %123 {offsets = [0, 0], sizes = [2, 96], strides = [1, 1]} : vector<2x128xf32> to vector<2x96xf32>
    %125 = arith.negf %124 : vector<2x96xf32>
    %126 = math.exp %125 : vector<2x96xf32>
    %cst_20 = arith.constant 1.000000e+00 : f32
    %127 = vector.broadcast %cst_20 : f32 to vector<2x96xf32>
    %128 = arith.addf %127, %126 : vector<2x96xf32>
    %129 = arith.divf %127, %128 : vector<2x96xf32>
    %130 = vector.extract_strided_slice %123 {offsets = [0, 96], sizes = [2, 32], strides = [1, 1]} : vector<2x128xf32> to vector<2x32xf32>
    %131 = math.tanh %130 : vector<2x32xf32>
    %132 = vector.extract_strided_slice %129 {offsets = [0, 0], sizes = [2, 32], strides = [1, 1]} : vector<2x96xf32> to vector<2x32xf32>
    %133 = vector.extract_strided_slice %129 {offsets = [0, 32], sizes = [2, 32], strides = [1, 1]} : vector<2x96xf32> to vector<2x32xf32>
    %134 = vector.extract_strided_slice %129 {offsets = [0, 64], sizes = [2, 32], strides = [1, 1]} : vector<2x96xf32> to vector<2x32xf32>
    %135 = arith.mulf %133, %115 : vector<2x32xf32>
    %136 = arith.mulf %132, %131 : vector<2x32xf32>
    %137 = arith.addf %135, %136 : vector<2x32xf32>
    %138 = math.tanh %137 : vector<2x32xf32>
    %139 = arith.mulf %134, %138 : vector<2x32xf32>
    %140 = vector.extract_strided_slice %3 {offsets = [0, 6, 0], sizes = [2, 1, 128], strides = [1, 1, 1]} : vector<2x8x128xf32> to vector<2x1x128xf32>
    %141 = vector.shape_cast %140 : vector<2x1x128xf32> to vector<2x128xf32>
    %142 = vector.broadcast %5 : vector<1x128xf32> to vector<2x128xf32>
    %143 = arith.addf %141, %142 : vector<2x128xf32>
    %cst_21 = arith.constant dense<0.000000e+00> : vector<2x128xf32>
    %144 = tpu.matmul %139, %4, %cst_21 {dimension_numbers = #tpu.dot_dimension_numbers<[1], [0], [0], [1], [0, 0, 1, 1], [], []>} : vector<2x32xf32>, vector<32x128xf32>, vector<2x128xf32> -> vector<2x128xf32>
    %145 = arith.addf %143, %144 : vector<2x128xf32>
    %146 = vector.extract_strided_slice %145 {offsets = [0, 0], sizes = [2, 96], strides = [1, 1]} : vector<2x128xf32> to vector<2x96xf32>
    %147 = arith.negf %146 : vector<2x96xf32>
    %148 = math.exp %147 : vector<2x96xf32>
    %cst_22 = arith.constant 1.000000e+00 : f32
    %149 = vector.broadcast %cst_22 : f32 to vector<2x96xf32>
    %150 = arith.addf %149, %148 : vector<2x96xf32>
    %151 = arith.divf %149, %150 : vector<2x96xf32>
    %152 = vector.extract_strided_slice %145 {offsets = [0, 96], sizes = [2, 32], strides = [1, 1]} : vector<2x128xf32> to vector<2x32xf32>
    %153 = math.tanh %152 : vector<2x32xf32>
    %154 = vector.extract_strided_slice %151 {offsets = [0, 0], sizes = [2, 32], strides = [1, 1]} : vector<2x96xf32> to vector<2x32xf32>
    %155 = vector.extract_strided_slice %151 {offsets = [0, 32], sizes = [2, 32], strides = [1, 1]} : vector<2x96xf32> to vector<2x32xf32>
    %156 = vector.extract_strided_slice %151 {offsets = [0, 64], sizes = [2, 32], strides = [1, 1]} : vector<2x96xf32> to vector<2x32xf32>
    %157 = arith.mulf %155, %137 : vector<2x32xf32>
    %158 = arith.mulf %154, %153 : vector<2x32xf32>
    %159 = arith.addf %157, %158 : vector<2x32xf32>
    %160 = math.tanh %159 : vector<2x32xf32>
    %161 = arith.mulf %156, %160 : vector<2x32xf32>
    %162 = vector.extract_strided_slice %3 {offsets = [0, 7, 0], sizes = [2, 1, 128], strides = [1, 1, 1]} : vector<2x8x128xf32> to vector<2x1x128xf32>
    %163 = vector.shape_cast %162 : vector<2x1x128xf32> to vector<2x128xf32>
    %164 = vector.broadcast %5 : vector<1x128xf32> to vector<2x128xf32>
    %165 = arith.addf %163, %164 : vector<2x128xf32>
    %cst_23 = arith.constant dense<0.000000e+00> : vector<2x128xf32>
    %166 = tpu.matmul %161, %4, %cst_23 {dimension_numbers = #tpu.dot_dimension_numbers<[1], [0], [0], [1], [0, 0, 1, 1], [], []>} : vector<2x32xf32>, vector<32x128xf32>, vector<2x128xf32> -> vector<2x128xf32>
    %167 = arith.addf %165, %166 : vector<2x128xf32>
    %168 = vector.extract_strided_slice %167 {offsets = [0, 0], sizes = [2, 96], strides = [1, 1]} : vector<2x128xf32> to vector<2x96xf32>
    %169 = arith.negf %168 : vector<2x96xf32>
    %170 = math.exp %169 : vector<2x96xf32>
    %cst_24 = arith.constant 1.000000e+00 : f32
    %171 = vector.broadcast %cst_24 : f32 to vector<2x96xf32>
    %172 = arith.addf %171, %170 : vector<2x96xf32>
    %173 = arith.divf %171, %172 : vector<2x96xf32>
    %174 = vector.extract_strided_slice %167 {offsets = [0, 96], sizes = [2, 32], strides = [1, 1]} : vector<2x128xf32> to vector<2x32xf32>
    %175 = math.tanh %174 : vector<2x32xf32>
    %176 = vector.extract_strided_slice %173 {offsets = [0, 0], sizes = [2, 32], strides = [1, 1]} : vector<2x96xf32> to vector<2x32xf32>
    %177 = vector.extract_strided_slice %173 {offsets = [0, 32], sizes = [2, 32], strides = [1, 1]} : vector<2x96xf32> to vector<2x32xf32>
    %178 = vector.extract_strided_slice %173 {offsets = [0, 64], sizes = [2, 32], strides = [1, 1]} : vector<2x96xf32> to vector<2x32xf32>
    %179 = arith.mulf %177, %159 : vector<2x32xf32>
    %180 = arith.mulf %176, %175 : vector<2x32xf32>
    %181 = arith.addf %179, %180 : vector<2x32xf32>
    %182 = math.tanh %181 : vector<2x32xf32>
    %183 = arith.mulf %178, %182 : vector<2x32xf32>
    %c0_25 = arith.constant 0 : index
    %c0_26 = arith.constant 0 : index
    %184 = vector.load %arg4[%c0_25, %c0_26] : memref<32x24xf32, #tpu.memory_space<vmem>>, vector<32x24xf32>
    %c0_27 = arith.constant 0 : index
    %c0_28 = arith.constant 0 : index
    %185 = vector.load %arg5[%c0_27, %c0_28] : memref<1x24xf32, #tpu.memory_space<vmem>>, vector<1x24xf32>
    %cst_29 = arith.constant dense<0.000000e+00> : vector<2x24xf32>
    %186 = tpu.matmul %183, %184, %cst_29 {dimension_numbers = #tpu.dot_dimension_numbers<[1], [0], [0], [1], [0, 0, 1, 1], [], []>} : vector<2x32xf32>, vector<32x24xf32>, vector<2x24xf32> -> vector<2x24xf32>
    %187 = vector.broadcast %185 : vector<1x24xf32> to vector<2x24xf32>
    %188 = arith.addf %186, %187 : vector<2x24xf32>
    %cst_30 = arith.constant 0.000000e+00 : f32
    %189 = vector.broadcast %cst_30 : f32 to vector<2x24xf32>
    %190 = arith.maximumf %188, %189 : vector<2x24xf32>
    %c0_31 = arith.constant 0 : index
    %c0_32 = arith.constant 0 : index
    %191 = vector.load %arg6[%c0_31, %c0_32] : memref<24x8xf32, #tpu.memory_space<vmem>>, vector<24x8xf32>
    %c0_33 = arith.constant 0 : index
    %c0_34 = arith.constant 0 : index
    %192 = vector.load %arg7[%c0_33, %c0_34] : memref<1x8xf32, #tpu.memory_space<vmem>>, vector<1x8xf32>
    %cst_35 = arith.constant dense<0.000000e+00> : vector<2x8xf32>
    %193 = tpu.matmul %190, %191, %cst_35 {dimension_numbers = #tpu.dot_dimension_numbers<[1], [0], [0], [1], [0, 0, 1, 1], [], []>} : vector<2x24xf32>, vector<24x8xf32>, vector<2x8xf32> -> vector<2x8xf32>
    %194 = vector.broadcast %192 : vector<1x8xf32> to vector<2x8xf32>
    %195 = arith.addf %193, %194 : vector<2x8xf32>
    %c0_36 = arith.constant 0 : index
    %c0_37 = arith.constant 0 : index
    %196 = vector.load %arg8[%c0_36, %c0_37] : memref<2x8xf32, #tpu.memory_space<vmem>>, vector<2x8xf32>
    tpu.vector_store %arg8[%c0_36, %c0_37], %195 {strides = array<i32>} : memref<2x8xf32, #tpu.memory_space<vmem>>, vector<2x8xf32>,
    return
  }
}

</mosaic_0001>

<bundles_post_ra>
// kernel: tpu_custom_call.1
= control target key start
LH: loop header
LB: loop body
LE: loop exit
PB: predicated region body
PF: predicated region fallthrough
CT: control target
= control target key end

     0   :  { %vm34_vm0 = vcmask 130048   ;;  %v1843_v3 = vmov 0.0|0.0   ;;  %vm1844_vm1 = vmmov 0   ;;  %v1845_v10 = vmov 0.0   ;;  %s2115_s0 = inlined_call_operand.vmem [shape: f32[16,16], index: 0, kind: input, shape index: {}]   ;;  %s2116_s1 = inlined_call_operand.vmem [shape: f32[16,128], index: 1, kind: input, shape index: {}]   ;;  %s2117_s2 = inlined_call_operand.vmem [shape: f32[32,128], index: 2, kind: input, shape index: {}]   ;;  %s2118_s3 = inlined_call_operand.vmem [shape: f32[1,128], index: 3, kind: input, shape index: {}]   ;;  %s2119_s4 = inlined_call_operand.vmem [shape: f32[32,24], index: 4, kind: input, shape index: {}]   ;;  %s2120_s5 = inlined_call_operand.vmem [shape: f32[1,24], index: 5, kind: input, shape index: {}]   ;;  %s2121_s6 = inlined_call_operand.vmem [shape: f32[24,8], index: 6, kind: input, shape index: {}]   ;;  %s2122_s7 = inlined_call_operand.vmem [shape: f32[1,8], index: 7, kind: input, shape index: {}]   ;;  %s2123_s8 = inlined_call_operand.hbm [shape: f32[2,8], index: 8, kind: output, shape index: {}]  }
   0x1   :  { %v32_v0 = vld [vmem:[%s2116_s1] sm:$0xff]  ;;  %v33_v1 = vld [vmem:[%s2116_s1 + $0x8] sm:$0xff]  ;;  %1628 = vmatprep.subr.bf16.mxu1 %v1843_v3  ;;  %v118_v8 = vld [vmem:[%s2117_s2 + $0x10] sm:$0xff]  ;;  %1524 = vmatprep.mubr.msk.f32.mxu1 %vm1844_vm1, %v1845_v10 }
   0x2   :  { %v116_v2 = vld [vmem:[%s2117_s2] sm:$0xff]  ;;  %v1624_v4 = vpack.c.bf16 %v33_v1, %v32_v0  ;;  %v117_v5 = vld [vmem:[%s2117_s2 + $0x8] sm:$0xff]  ;;  %v119_v9 = vld [vmem:[%s2117_s2 + $0x18] sm:$0xff] }
   0x3   :  { %v30_v6 = vld [vmem:[%s2115_s0] sm:$0xff]  ;;  %v1910_v7 = vpack.c.bf16 %v117_v5, %v116_v2 }
   0x4   :  { %1513 = vmatprep.mubr.msk.f32.mxu0 %vm34_vm0, %v30_v6 }
   0x5   :  { %13 = vsyncpa [#allocation3], 0  ;;  %1625 = vmatprep.subr.bf16.mxu0 %v1624_v4  ;;  %1630 = vmatpush3.bf16.msra.mxu1 %v1910_v7  ;;  %v31_v11 = vld [vmem:[%s2115_s0 + $0x8] sm:$0xff]  ;;  %v1925_v12 = vpack.c.bf16 %v119_v9, %v118_v8  ;;  %v1428_v15 = vld [vmem:[%s2118_s3] ss:$0 sm:$0xff]  ;;  %s1846_s20 = smov 32  }
   0x6   :  { %1627 = vmatpush3.bf16.msra.mxu0 %v1624_v4  ;;  %1631 = vmatprep.subr.bf16.mxu1 %v1843_v3  ;;  %vm260_vm2 = vcmask 1041409   ;;  %s1847_s3 = smov 64   ;;  %vm129_vm3 = vcmask 261120   ;;  %vm1336_vm4 = vcmask 195584   ;;  %s1848_s15 = smov [#allocation2]   ;;  %vm1410_vm5 = vcmask 58368  }
   0x7   :  { %1634 = vmatprep.subr.bf16.mxu0 %v1843_v3  ;;  %s1418_s16 = sshll.u32 %s1848_s15, 4  ;;  %s1419_s16 = int_to_ptr.vmem [resolvable:$true] %s1418_s16 }
   0x8   :  { %p1824_p1 = scmp.lt.s32.totalorder %s1419_s16, %s1419_s16 }
   0x9   :  { %1514 = vmatmul.mubr.msk.f32.vlgmr.msra.gmra.mrb[0].mxu0 %vm34_vm0, %v31_v11  ;;  %1633 = vmatpush3.bf16.msra.mxu1 %v1925_v12 }
   0xa   :  { %1636 = vmatpush3.bf16.msra.mxu0 %v1910_v7  ;;  %1535 = vmatprep.mubr.msk.f32.mxu0 %vm1844_vm1, %v1845_v10 }
   0xb   :  { %1637 = vmatprep.subr.bf16.mxu0 %v1843_v3  ;;  %1640 = vmatprep.subr.bf16.mxu1 %v1843_v3 }
   0xc   :  { %1525 = vmatmul.mubr.f32.vlgmr.msra.gmra.mrb[0].mxu1 %v1845_v10 }
   0xd   :  { %1642 = vmatpush3.bf16.msra.mxu1 %v1910_v7  ;;  %1546 = vmatprep.mubr.msk.f32.mxu1 %vm1844_vm1, %v1845_v10 }
   0xe   :  { %1639 = vmatpush3.bf16.msra.mxu0 %v1925_v12  ;;  %1643 = vmatprep.subr.bf16.mxu1 %v1843_v3 }
   0xf   :  { %1646 = vmatprep.subr.bf16.mxu0 %v1843_v3 }
  0x11   :  { %1645 = vmatpush3.bf16.msra.mxu1 %v1925_v12 }
  0x12   :  { %1652 = vmatprep.subr.bf16.mxu1 %v1843_v3 }
  0xdc   :  { %v1515_v13 = vpop.f32.mrb[0].mxu0 }
  0xdd   :  { %v107_v14 = vpop.f32.mrb[1].mxu0  ;;  %v1948_v16 = vadd.f32 %v1515_v13, %v1428_v15 }
  0xde   :  { %v1950_v20 = vadd.f32 %v1428_v15, %v107_v14 }
  0xdf   :  { %v199_v17 = vpop.f32.mrb[0].mxu1 }
  0xe0   :  { %v204_v18 = vrot.slane %v199_v17, 1  ;;  %v1526_v19 = vpop.f32.mrb[1].mxu1  ;;  %v207_v22 = vadd.f32 %v199_v17, %v1950_v20 }
  0xe2   :  { %v208_v21 = vadd.f32 %v204_v18, %v1948_v16  ;;  %v1429_v26 = vmul.f32 -1.442695, %v207_v22 }
  0xe4   :  { %1691 = vtanh.f32 %v208_v21  ;;  %v1430_v25 = vmul.f32 -1.442695, %v208_v21 }
  0xe5   :  { %1693 = vtanh.f32 %v207_v22 }
  0xe6   :  { %1695 = vpow2.f32 %v1430_v25 }
  0xe7   :  { %1697 = vpow2.f32 %v1429_v26 }
  0xee   :  { %v1692_v23 = vpop.eup %1691 }
  0xef   :  { %229 = vrot.lane.b32.xlu0 %v1692_v23, %s1846_s20  ;;  %v1694_v24 = vpop.eup %1693 }
  0xf0   :  { %v1696_v27 = vpop.eup %1695 }
  0xf1   :  { %v216_v28 = vadd.f32 1.0, %v1696_v27  ;;  %v1698_v29 = vpop.eup %1697 }
  0xf2   :  { %v215_v30 = vadd.f32 1.0, %v1698_v29 }
  0xf3   :  { %227 = vrot.lane.b32.xlu0 %v1694_v24, %s1846_s20  ;;  %1699 = vrcp.f32 %v216_v28 }
  0xf4   :  { %1701 = vrcp.f32 %v215_v30 }
  0xfd   :  { %v1700_v31 = vpop.eup %1699 }
  0xfe   :  { %v1702_v34 = vpop.eup %1701  ;;  %v224_v37 = vmul.f32 0.0, %v1700_v31 }
  0xff   :  { %v223_v40 = vmul.f32 0.0, %v1702_v34 }
 0x161   :  { %v230_v32 = vpop.permute.xlu0 %229 }
 0x162   :  { %v234_v33 = vmul.f32 %v1700_v31, %v230_v32 }
 0x164   :  { %239 = vrot.lane.b32.xlu1 %v234_v33, %s1846_s20 }
 0x165   :  { %v228_v35 = vpop.permute.xlu0 %227 }
 0x166   :  { %v233_v36 = vmul.f32 %v1702_v34, %v228_v35 }
 0x168   :  { %237 = vrot.lane.b32.xlu1 %v233_v36, %s1846_s20 }
 0x1d6   :  { %v240_v38 = vpop.permute.xlu1 %239 }
 0x1d7   :  { %v244_v39 = vadd.f32 %v240_v38, %v224_v37 }
 0x1d9   :  { %1703 = vtanh.f32 %v244_v39  ;;  %v359_v9 = vrot.slane %v244_v39, 7 }
 0x1da   :  { %v238_v41 = vpop.permute.xlu1 %237 }
 0x1db   :  { %v243_v42 = vadd.f32 %v238_v41, %v223_v40 }
 0x1dd   :  { %1705 = vtanh.f32 %v243_v42  ;;  %v358_v13 = vrot.slane %v243_v42, 7 }
 0x1e3   :  { %v1704_v43 = vpop.eup %1703 }
 0x1e4   :  { %251 = vrot.lane.b32.xlu0 %v1704_v43, %s1846_s20 }
 0x1e7   :  { %v1706_v44 = vpop.eup %1705 }
 0x1e8   :  { %249 = vrot.lane.b32.xlu1 %v1706_v44, %s1846_s20 }
 0x256   :  { %v252_v45 = vpop.permute.xlu0 %251 }
 0x257   :  { %v256_v46 = vmul.f32 %v1700_v31, %v252_v45 }
 0x259   :  { %v259_v48 = vrot.slane %v256_v46, 7 }
 0x25a   :  { %v250_v47 = vpop.permute.xlu1 %249 }
 0x25b   :  { %v255_v49 = vmul.f32 %v1702_v34, %v250_v47 }
 0x25d   :  { %v261_v50 = vsel %vm260_vm2, %v259_v48, %v255_v49 }
 0x25e   :  { %262 = vrot.lane.b32.xlu0 %v261_v50, %s1847_s3 }
 0x2d0   :  { %v263_v51 = vpop.permute.xlu0 %262 }
 0x2d1   :  { %1536 = vmatmul.mubr.msk.f32.vlgmr.msra.gmra.mrb[2].mxu0 %vm129_vm3, %v263_v51 }
 0x2d2   :  { %1648 = vmatpush3.bf16.msra.mxu0 %v1910_v7  ;;  %1557 = vmatprep.mubr.msk.f32.mxu0 %vm1844_vm1, %v1845_v10 }
 0x2d3   :  { %1649 = vmatprep.subr.bf16.mxu0 %v1843_v3 }
 0x2d6   :  { %1651 = vmatpush3.bf16.msra.mxu0 %v1925_v12 }
 0x2d7   :  { %1658 = vmatprep.subr.bf16.mxu0 %v1843_v3 }
 0x3a4   :  { %v332_v52 = vpop.f32.mrb[2].mxu0 }
 0x3a5   :  { %v337_v53 = vrot.slane %v332_v52, 7  ;;  %v341_v54 = vadd.f32 %v332_v52, %v1948_v16  ;;  %v1537_v55 = vpop.f32.mrb[3].mxu0 }
 0x3a7   :  { %v340_v56 = vadd.f32 %v337_v53, %v1950_v20  ;;  %1707 = vtanh.f32 %v341_v54  ;;  %v1433_v59 = vmul.f32 -1.442695, %v341_v54 }
 0x3a9   :  { %1709 = vtanh.f32 %v340_v56  ;;  %v1432_v60 = vmul.f32 -1.442695, %v340_v56 }
 0x3aa   :  { %1711 = vpow2.f32 %v1433_v59 }
 0x3ab   :  { %1713 = vpow2.f32 %v1432_v60 }
 0x3b1   :  { %v1708_v57 = vpop.eup %1707 }
 0x3b2   :  { %368 = vrot.lane.b32.xlu0 %v1708_v57, %s1846_s20 }
 0x3b3   :  { %v1710_v58 = vpop.eup %1709 }
 0x3b4   :  { %366 = vrot.lane.b32.xlu1 %v1710_v58, %s1846_s20  ;;  %v1712_v61 = vpop.eup %1711 }
 0x3b5   :  { %v1714_v62 = vpop.eup %1713  ;;  %v349_v63 = vadd.f32 1.0, %v1712_v61 }
 0x3b6   :  { %v348_v0 = vadd.f32 1.0, %v1714_v62 }
 0x3b7   :  { %1715 = vrcp.f32 %v349_v63 }
 0x3b8   :  { %1717 = vrcp.f32 %v348_v0 }
 0x3c1   :  { %v1716_v1 = vpop.eup %1715 }
 0x3c2   :  { %v1718_v5 = vpop.eup %1717  ;;  %v363_v11 = vmul.f32 %v1716_v1, %v359_v9 }
 0x3c3   :  { %v362_v17 = vmul.f32 %v1718_v5, %v358_v13 }
 0x424   :  { %v369_v2 = vpop.permute.xlu0 %368 }
 0x425   :  { %v373_v4 = vmul.f32 %v1716_v1, %v369_v2 }
 0x426   :  { %v367_v6 = vpop.permute.xlu1 %366 }
 0x427   :  { %378 = vrot.lane.b32.xlu0 %v373_v4, %s1846_s20  ;;  %v372_v8 = vmul.f32 %v1718_v5, %v367_v6 }
 0x429   :  { %376 = vrot.lane.b32.xlu1 %v372_v8, %s1846_s20 }
 0x499   :  { %v379_v14 = vpop.permute.xlu0 %378 }
 0x49a   :  { %v383_v15 = vadd.f32 %v379_v14, %v363_v11 }
 0x49b   :  { %v377_v18 = vpop.permute.xlu1 %376 }
 0x49c   :  { %1719 = vtanh.f32 %v383_v15  ;;  %v382_v19 = vadd.f32 %v377_v18, %v362_v17  ;;  %v498_v51 = vrot.slane %v383_v15, 7 }
 0x49e   :  { %1721 = vtanh.f32 %v382_v19  ;;  %v497_v50 = vrot.slane %v382_v19, 7 }
 0x4a6   :  { %v1720_v21 = vpop.eup %1719 }
 0x4a7   :  { %390 = vrot.lane.b32.xlu0 %v1720_v21, %s1846_s20 }
 0x4a8   :  { %v1722_v22 = vpop.eup %1721 }
 0x4a9   :  { %388 = vrot.lane.b32.xlu1 %v1722_v22, %s1846_s20 }
 0x519   :  { %v391_v23 = vpop.permute.xlu0 %390 }
 0x51a   :  { %v395_v26 = vmul.f32 %v1716_v1, %v391_v23 }
 0x51b   :  { %v389_v24 = vpop.permute.xlu1 %388 }
 0x51c   :  { %v394_v25 = vmul.f32 %v1718_v5, %v389_v24 }
 0x51e   :  { %v398_v27 = vrot.slane %v394_v25, 1 }
 0x520   :  { %v399_v28 = vsel %vm260_vm2, %v395_v26, %v398_v27 }
 0x521   :  { %400 = vrot.lane.b32.xlu1 %v399_v28, %s1847_s3 }
 0x593   :  { %v401_v29 = vpop.permute.xlu1 %400 }
 0x594   :  { %1547 = vmatmul.mubr.msk.f32.vlgmr.msra.gmra.mrb[2].mxu1 %vm129_vm3, %v401_v29 }
 0x595   :  { %1654 = vmatpush3.bf16.msra.mxu1 %v1910_v7  ;;  %1568 = vmatprep.mubr.msk.f32.mxu1 %vm1844_vm1, %v1845_v10 }
 0x596   :  { %1655 = vmatprep.subr.bf16.mxu1 %v1843_v3 }
 0x599   :  { %1657 = vmatpush3.bf16.msra.mxu1 %v1925_v12 }
 0x59a   :  { %1664 = vmatprep.subr.bf16.mxu1 %v1843_v3 }
 0x667   :  { %v470_v30 = vpop.f32.mrb[2].mxu1 }
 0x668   :  { %v475_v31 = vrot.slane %v470_v30, 6  ;;  %v476_v32 = vrot.slane %v470_v30, 7  ;;  %v1548_v33 = vpop.f32.mrb[3].mxu1 }
 0x66a   :  { %v479_v34 = vadd.f32 %v475_v31, %v1950_v20  ;;  %v480_v35 = vadd.f32 %v476_v32, %v1948_v16 }
 0x66c   :  { %1723 = vtanh.f32 %v479_v34  ;;  %v1435_v38 = vmul.f32 -1.442695, %v479_v34  ;;  %v1436_v39 = vmul.f32 -1.442695, %v480_v35 }
 0x66d   :  { %1725 = vtanh.f32 %v480_v35 }
 0x66e   :  { %1727 = vpow2.f32 %v1435_v38 }
 0x66f   :  { %1729 = vpow2.f32 %v1436_v39 }
 0x676   :  { %v1724_v36 = vpop.eup %1723 }
 0x677   :  { %v1726_v37 = vpop.eup %1725  ;;  %505 = vrot.lane.b32.xlu0 %v1724_v36, %s1846_s20 }
 0x678   :  { %507 = vrot.lane.b32.xlu1 %v1726_v37, %s1846_s20  ;;  %v1728_v40 = vpop.eup %1727 }
 0x679   :  { %v1730_v41 = vpop.eup %1729  ;;  %v487_v42 = vadd.f32 1.0, %v1728_v40 }
 0x67a   :  { %v488_v43 = vadd.f32 1.0, %v1730_v41 }
 0x67b   :  { %1731 = vrcp.f32 %v487_v42 }
 0x67c   :  { %1733 = vrcp.f32 %v488_v43 }
 0x685   :  { %v1732_v44 = vpop.eup %1731 }
 0x686   :  { %v1734_v46 = vpop.eup %1733  ;;  %v501_v52 = vmul.f32 %v1732_v44, %v497_v50 }
 0x687   :  { %v502_v53 = vmul.f32 %v1734_v46, %v498_v51 }
 0x6e9   :  { %v506_v45 = vpop.permute.xlu0 %505 }
 0x6ea   :  { %v508_v47 = vpop.permute.xlu1 %507  ;;  %v511_v48 = vmul.f32 %v1732_v44, %v506_v45 }
 0x6eb   :  { %v512_v49 = vmul.f32 %v1734_v46, %v508_v47 }
 0x6ec   :  { %515 = vrot.lane.b32.xlu0 %v511_v48, %s1846_s20 }
 0x6ed   :  { %517 = vrot.lane.b32.xlu1 %v512_v49, %s1846_s20 }
 0x75e   :  { %v516_v54 = vpop.permute.xlu0 %515 }
 0x75f   :  { %v518_v55 = vpop.permute.xlu1 %517  ;;  %v521_v56 = vadd.f32 %v516_v54, %v501_v52 }
 0x760   :  { %v522_v57 = vadd.f32 %v518_v55, %v502_v53 }
 0x761   :  { %1735 = vtanh.f32 %v521_v56  ;;  %v637_v30 = vrot.slane %v521_v56, 7 }
 0x762   :  { %1737 = vtanh.f32 %v522_v57  ;;  %v638_v31 = vrot.slane %v522_v57, 7 }
 0x76b   :  { %v1736_v58 = vpop.eup %1735 }
 0x76c   :  { %v1738_v59 = vpop.eup %1737  ;;  %527 = vrot.lane.b32.xlu0 %v1736_v58, %s1846_s20 }
 0x76d   :  { %529 = vrot.lane.b32.xlu1 %v1738_v59, %s1846_s20 }
 0x7de   :  { %v528_v60 = vpop.permute.xlu0 %527 }
 0x7df   :  { %v530_v61 = vpop.permute.xlu1 %529  ;;  %v533_v62 = vmul.f32 %v1732_v44, %v528_v60 }
 0x7e0   :  { %v534_v63 = vmul.f32 %v1734_v46, %v530_v61 }
 0x7e1   :  { %v537_v0 = vrot.slane %v533_v62, 2 }
 0x7e2   :  { %v538_v1 = vrot.slane %v534_v63, 1 }
 0x7e4   :  { %v539_v2 = vsel %vm260_vm2, %v538_v1, %v537_v0 }
 0x7e5   :  { %540 = vrot.lane.b32.xlu0 %v539_v2, %s1847_s3 }
 0x857   :  { %v541_v4 = vpop.permute.xlu0 %540 }
 0x858   :  { %1558 = vmatmul.mubr.msk.f32.vlgmr.msra.gmra.mrb[4].mxu0 %vm129_vm3, %v541_v4 }
 0x859   :  { %1660 = vmatpush3.bf16.msra.mxu0 %v1910_v7  ;;  %1579 = vmatprep.mubr.msk.f32.mxu0 %vm1844_vm1, %v1845_v10 }
 0x85a   :  { %1661 = vmatprep.subr.bf16.mxu0 %v1843_v3 }
 0x85d   :  { %1663 = vmatpush3.bf16.msra.mxu0 %v1925_v12 }
 0x85e   :  { %1670 = vmatprep.subr.bf16.mxu0 %v1843_v3 }
 0x92b   :  { %v610_v5 = vpop.f32.mrb[4].mxu0 }
 0x92c   :  { %v615_v6 = vrot.slane %v610_v5, 5  ;;  %v616_v8 = vrot.slane %v610_v5, 6  ;;  %v1559_v9 = vpop.f32.mrb[5].mxu0 }
 0x92e   :  { %v619_v11 = vadd.f32 %v615_v6, %v1950_v20  ;;  %v620_v13 = vadd.f32 %v616_v8, %v1948_v16 }
 0x930   :  { %1739 = vtanh.f32 %v619_v11  ;;  %v1438_v17 = vmul.f32 -1.442695, %v619_v11  ;;  %v1439_v18 = vmul.f32 -1.442695, %v620_v13 }
 0x931   :  { %1741 = vtanh.f32 %v620_v13 }
 0x932   :  { %1743 = vpow2.f32 %v1438_v17 }
 0x933   :  { %1745 = vpow2.f32 %v1439_v18 }
 0x93a   :  { %v1740_v14 = vpop.eup %1739 }
 0x93b   :  { %v1742_v15 = vpop.eup %1741  ;;  %645 = vrot.lane.b32.xlu1 %v1740_v14, %s1846_s20 }
 0x93c   :  { %647 = vrot.lane.b32.xlu0 %v1742_v15, %s1846_s20  ;;  %v1744_v19 = vpop.eup %1743 }
 0x93d   :  { %v1746_v21 = vpop.eup %1745  ;;  %v627_v22 = vadd.f32 1.0, %v1744_v19 }
 0x93e   :  { %v628_v23 = vadd.f32 1.0, %v1746_v21 }
 0x93f   :  { %1747 = vrcp.f32 %v627_v22 }
 0x940   :  { %1749 = vrcp.f32 %v628_v23 }
 0x949   :  { %v1748_v24 = vpop.eup %1747 }
 0x94a   :  { %v1750_v26 = vpop.eup %1749  ;;  %v641_v32 = vmul.f32 %v1748_v24, %v637_v30 }
 0x94b   :  { %v642_v33 = vmul.f32 %v1750_v26, %v638_v31 }
 0x9ad   :  { %v646_v25 = vpop.permute.xlu1 %645 }
 0x9ae   :  { %v648_v27 = vpop.permute.xlu0 %647  ;;  %v651_v28 = vmul.f32 %v1748_v24, %v646_v25 }
 0x9af   :  { %v652_v29 = vmul.f32 %v1750_v26, %v648_v27 }
 0x9b0   :  { %655 = vrot.lane.b32.xlu1 %v651_v28, %s1846_s20 }
 0x9b1   :  { %657 = vrot.lane.b32.xlu0 %v652_v29, %s1846_s20 }
 0xa22   :  { %v656_v34 = vpop.permute.xlu1 %655 }
 0xa23   :  { %v658_v35 = vpop.permute.xlu0 %657  ;;  %v661_v36 = vadd.f32 %v656_v34, %v641_v32 }
 0xa24   :  { %v662_v37 = vadd.f32 %v658_v35, %v642_v33 }
 0xa25   :  { %1751 = vtanh.f32 %v661_v36  ;;  %v777_v5 = vrot.slane %v661_v36, 7 }
 0xa26   :  { %1753 = vtanh.f32 %v662_v37  ;;  %v778_v6 = vrot.slane %v662_v37, 7 }
 0xa2f   :  { %v1752_v38 = vpop.eup %1751 }
 0xa30   :  { %v1754_v39 = vpop.eup %1753  ;;  %667 = vrot.lane.b32.xlu1 %v1752_v38, %s1846_s20 }
 0xa31   :  { %669 = vrot.lane.b32.xlu0 %v1754_v39, %s1846_s20 }
 0xaa2   :  { %v668_v40 = vpop.permute.xlu1 %667 }
 0xaa3   :  { %v670_v41 = vpop.permute.xlu0 %669  ;;  %v673_v42 = vmul.f32 %v1748_v24, %v668_v40 }
 0xaa4   :  { %v674_v43 = vmul.f32 %v1750_v26, %v670_v41 }
 0xaa5   :  { %v677_v44 = vrot.slane %v673_v42, 3 }
 0xaa6   :  { %v678_v45 = vrot.slane %v674_v43, 2 }
 0xaa8   :  { %v679_v46 = vsel %vm260_vm2, %v678_v45, %v677_v44 }
 0xaa9   :  { %680 = vrot.lane.b32.xlu1 %v679_v46, %s1847_s3 }
 0xb1b   :  { %v681_v47 = vpop.permute.xlu1 %680 }
 0xb1c   :  { %1569 = vmatmul.mubr.msk.f32.vlgmr.msra.gmra.mrb[4].mxu1 %vm129_vm3, %v681_v47 }
 0xb1d   :  { %1666 = vmatpush3.bf16.msra.mxu1 %v1910_v7  ;;  %1590 = vmatprep.mubr.msk.f32.mxu1 %vm1844_vm1, %v1845_v10 }
 0xb1e   :  { %1667 = vmatprep.subr.bf16.mxu1 %v1843_v3 }
 0xb21   :  { %1669 = vmatpush3.bf16.msra.mxu1 %v1925_v12 }
 0xb22   :  { %1676 = vmatprep.subr.bf16.mxu1 %v1843_v3 }
 0xbef   :  { %v750_v48 = vpop.f32.mrb[4].mxu1 }
 0xbf0   :  { %v755_v49 = vrot.slane %v750_v48, 4  ;;  %v756_v50 = vrot.slane %v750_v48, 5  ;;  %v1570_v51 = vpop.f32.mrb[5].mxu1 }
 0xbf2   :  { %v759_v52 = vadd.f32 %v755_v49, %v1950_v20  ;;  %v760_v53 = vadd.f32 %v756_v50, %v1948_v16 }
 0xbf4   :  { %1755 = vtanh.f32 %v759_v52  ;;  %v1441_v56 = vmul.f32 -1.442695, %v759_v52  ;;  %v1442_v57 = vmul.f32 -1.442695, %v760_v53 }
 0xbf5   :  { %1757 = vtanh.f32 %v760_v53 }
 0xbf6   :  { %1759 = vpow2.f32 %v1441_v56 }
 0xbf7   :  { %1761 = vpow2.f32 %v1442_v57 }
 0xbfe   :  { %v1756_v54 = vpop.eup %1755 }
 0xbff   :  { %v1758_v55 = vpop.eup %1757  ;;  %785 = vrot.lane.b32.xlu0 %v1756_v54, %s1846_s20 }
 0xc00   :  { %787 = vrot.lane.b32.xlu1 %v1758_v55, %s1846_s20  ;;  %v1760_v58 = vpop.eup %1759 }
 0xc01   :  { %v1762_v59 = vpop.eup %1761  ;;  %v767_v60 = vadd.f32 1.0, %v1760_v58 }
 0xc02   :  { %v768_v61 = vadd.f32 1.0, %v1762_v59 }
 0xc03   :  { %1763 = vrcp.f32 %v767_v60 }
 0xc04   :  { %1765 = vrcp.f32 %v768_v61 }
 0xc0d   :  { %v1764_v62 = vpop.eup %1763 }
 0xc0e   :  { %v1766_v0 = vpop.eup %1765  ;;  %v781_v8 = vmul.f32 %v1764_v62, %v777_v5 }
 0xc0f   :  { %v782_v9 = vmul.f32 %v1766_v0, %v778_v6 }
 0xc71   :  { %v786_v63 = vpop.permute.xlu0 %785 }
 0xc72   :  { %v788_v1 = vpop.permute.xlu1 %787  ;;  %v791_v2 = vmul.f32 %v1764_v62, %v786_v63 }
 0xc73   :  { %v792_v4 = vmul.f32 %v1766_v0, %v788_v1 }
 0xc74   :  { %795 = vrot.lane.b32.xlu0 %v791_v2, %s1846_s20 }
 0xc75   :  { %797 = vrot.lane.b32.xlu1 %v792_v4, %s1846_s20 }
 0xce6   :  { %v796_v11 = vpop.permute.xlu0 %795 }
 0xce7   :  { %v798_v13 = vpop.permute.xlu1 %797  ;;  %v801_v14 = vadd.f32 %v796_v11, %v781_v8 }
 0xce8   :  { %v802_v15 = vadd.f32 %v798_v13, %v782_v9 }
 0xce9   :  { %1767 = vtanh.f32 %v801_v14  ;;  %v917_v46 = vrot.slane %v801_v14, 7 }
 0xcea   :  { %1769 = vtanh.f32 %v802_v15  ;;  %v918_v47 = vrot.slane %v802_v15, 7 }
 0xcf3   :  { %v1768_v17 = vpop.eup %1767 }
 0xcf4   :  { %v1770_v18 = vpop.eup %1769  ;;  %807 = vrot.lane.b32.xlu0 %v1768_v17, %s1846_s20 }
 0xcf5   :  { %809 = vrot.lane.b32.xlu1 %v1770_v18, %s1846_s20 }
 0xd66   :  { %v808_v19 = vpop.permute.xlu0 %807 }
 0xd67   :  { %v810_v21 = vpop.permute.xlu1 %809  ;;  %v813_v22 = vmul.f32 %v1764_v62, %v808_v19 }
 0xd68   :  { %v814_v23 = vmul.f32 %v1766_v0, %v810_v21 }
 0xd69   :  { %v817_v24 = vrot.slane %v813_v22, 4 }
 0xd6a   :  { %v818_v25 = vrot.slane %v814_v23, 3 }
 0xd6c   :  { %v819_v26 = vsel %vm260_vm2, %v818_v25, %v817_v24 }
 0xd6d   :  { %820 = vrot.lane.b32.xlu0 %v819_v26, %s1847_s3 }
 0xddf   :  { %v821_v27 = vpop.permute.xlu0 %820 }
 0xde0   :  { %1580 = vmatmul.mubr.msk.f32.vlgmr.msra.gmra.mrb[6].mxu0 %vm129_vm3, %v821_v27 }
 0xde1   :  { %1672 = vmatpush3.bf16.msra.mxu0 %v1910_v7  ;;  %1601 = vmatprep.mubr.msk.f32.mxu0 %vm1844_vm1, %v1845_v10 }
 0xde2   :  { %1673 = vmatprep.subr.bf16.mxu0 %v1843_v3 }
 0xde5   :  { %1675 = vmatpush3.bf16.msra.mxu0 %v1925_v12 }
 0xde6   :  { %1682 = vmatprep.subr.bf16.mxu0 %v1843_v3 }
 0xeb3   :  { %v890_v28 = vpop.f32.mrb[6].mxu0 }
 0xeb4   :  { %v895_v29 = vrot.slane %v890_v28, 3  ;;  %v896_v30 = vrot.slane %v890_v28, 4  ;;  %v1581_v31 = vpop.f32.mrb[7].mxu0 }
 0xeb6   :  { %v899_v32 = vadd.f32 %v895_v29, %v1950_v20  ;;  %v900_v33 = vadd.f32 %v896_v30, %v1948_v16 }
 0xeb8   :  { %1771 = vtanh.f32 %v899_v32  ;;  %v1444_v35 = vmul.f32 -1.442695, %v899_v32  ;;  %v1445_v12 = vmul.f32 -1.442695, %v900_v33 }
 0xeb9   :  { %1773 = vtanh.f32 %v900_v33 }
 0xeba   :  { %1775 = vpow2.f32 %v1444_v35 }
 0xebb   :  { %1777 = vpow2.f32 %v1445_v12 }
 0xec2   :  { %v1772_v7 = vpop.eup %1771 }
 0xec3   :  { %v1774_v34 = vpop.eup %1773  ;;  %925 = vrot.lane.b32.xlu1 %v1772_v7, %s1846_s20 }
 0xec4   :  { %927 = vrot.lane.b32.xlu0 %v1774_v34, %s1846_s20  ;;  %v1776_v36 = vpop.eup %1775 }
 0xec5   :  { %v1778_v37 = vpop.eup %1777  ;;  %v907_v38 = vadd.f32 1.0, %v1776_v36 }
 0xec6   :  { %v908_v39 = vadd.f32 1.0, %v1778_v37 }
 0xec7   :  { %1779 = vrcp.f32 %v907_v38 }
 0xec8   :  { %1781 = vrcp.f32 %v908_v39 }
 0xed1   :  { %v1780_v40 = vpop.eup %1779 }
 0xed2   :  { %v1782_v42 = vpop.eup %1781  ;;  %v921_v48 = vmul.f32 %v1780_v40, %v917_v46 }
 0xed3   :  { %v922_v49 = vmul.f32 %v1782_v42, %v918_v47 }
 0xf35   :  { %v926_v41 = vpop.permute.xlu1 %925 }
 0xf36   :  { %v928_v43 = vpop.permute.xlu0 %927  ;;  %v931_v44 = vmul.f32 %v1780_v40, %v926_v41 }
 0xf37   :  { %v932_v45 = vmul.f32 %v1782_v42, %v928_v43 }
 0xf38   :  { %935 = vrot.lane.b32.xlu1 %v931_v44, %s1846_s20 }
 0xf39   :  { %937 = vrot.lane.b32.xlu0 %v932_v45, %s1846_s20 }
 0xfaa   :  { %v936_v50 = vpop.permute.xlu1 %935 }
 0xfab   :  { %v938_v51 = vpop.permute.xlu0 %937  ;;  %v941_v52 = vadd.f32 %v936_v50, %v921_v48 }
 0xfac   :  { %v942_v53 = vadd.f32 %v938_v51, %v922_v49 }
 0xfad   :  { %1783 = vtanh.f32 %v941_v52  ;;  %v1057_v26 = vrot.slane %v941_v52, 7 }
 0xfae   :  { %1785 = vtanh.f32 %v942_v53  ;;  %v1058_v27 = vrot.slane %v942_v53, 7 }
 0xfb7   :  { %v1784_v54 = vpop.eup %1783 }
 0xfb8   :  { %v1786_v55 = vpop.eup %1785  ;;  %947 = vrot.lane.b32.xlu1 %v1784_v54, %s1846_s20 }
 0xfb9   :  { %949 = vrot.lane.b32.xlu0 %v1786_v55, %s1846_s20 }
0x102a   :  { %v948_v56 = vpop.permute.xlu1 %947 }
0x102b   :  { %v950_v57 = vpop.permute.xlu0 %949  ;;  %v953_v58 = vmul.f32 %v1780_v40, %v948_v56 }
0x102c   :  { %v954_v59 = vmul.f32 %v1782_v42, %v950_v57 }
0x102d   :  { %v957_v60 = vrot.slane %v953_v58, 5 }
0x102e   :  { %v958_v61 = vrot.slane %v954_v59, 4 }
0x1030   :  { %v959_v62 = vsel %vm260_vm2, %v958_v61, %v957_v60 }
0x1031   :  { %960 = vrot.lane.b32.xlu1 %v959_v62, %s1847_s3 }
0x10a3   :  { %v961_v63 = vpop.permute.xlu1 %960 }
0x10a4   :  { %1591 = vmatmul.mubr.msk.f32.vlgmr.msra.gmra.mrb[6].mxu1 %vm129_vm3, %v961_v63 }
0x10a5   :  { %1612 = vmatprep.mubr.msk.f32.mxu1 %vm1844_vm1, %v1845_v10 }
0x1177   :  { %v1030_v0 = vpop.f32.mrb[6].mxu1 }
0x1178   :  { %v1035_v1 = vrot.slane %v1030_v0, 2  ;;  %v1036_v2 = vrot.slane %v1030_v0, 3  ;;  %v1592_v4 = vpop.f32.mrb[7].mxu1 }
0x117a   :  { %v1039_v5 = vadd.f32 %v1035_v1, %v1950_v20  ;;  %v1040_v6 = vadd.f32 %v1036_v2, %v1948_v16 }
0x117c   :  { %1787 = vtanh.f32 %v1039_v5  ;;  %v1447_v11 = vmul.f32 -1.442695, %v1039_v5  ;;  %v1448_v13 = vmul.f32 -1.442695, %v1040_v6  ;;  %v1235_v5 = vld [vmem:[%s2119_s4] sm:$0xff] }
0x117d   :  { %1789 = vtanh.f32 %v1040_v6  ;;  %v1236_v6 = vld [vmem:[%s2119_s4 + $0x8] sm:$0xff] }
0x117e   :  { %1791 = vpow2.f32 %v1447_v11  ;;  %v1238_v11 = vld [vmem:[%s2119_s4 + $0x18] sm:$0xff] }
0x117f   :  { %1793 = vpow2.f32 %v1448_v13 }
0x1186   :  { %v1788_v8 = vpop.eup %1787 }
0x1187   :  { %v1790_v9 = vpop.eup %1789  ;;  %1065 = vrot.lane.b32.xlu0 %v1788_v8, %s1846_s20  ;;  %v1237_v8 = vld [vmem:[%s2119_s4 + $0x10] sm:$0xff] }
0x1188   :  { %1067 = vrot.lane.b32.xlu1 %v1790_v9, %s1846_s20  ;;  %v1792_v14 = vpop.eup %1791  ;;  %v1677_v9 = vpack.c.bf16 %v1236_v6, %v1235_v5  ;;  %v1680_v13 = vpack.c.bf16 %v1238_v11, %v1237_v8 }
0x1189   :  { %v1794_v15 = vpop.eup %1793  ;;  %v1047_v17 = vadd.f32 1.0, %v1792_v14 }
0x118a   :  { %v1048_v18 = vadd.f32 1.0, %v1794_v15  ;;  %1678 = vmatpush3.bf16.msra.mxu1 %v1677_v9 }
0x118b   :  { %1795 = vrcp.f32 %v1047_v17  ;;  %1679 = vmatprep.subr.bf16.mxu1 %v1843_v3  ;;  %v1326_v17 = vld [vmem:[%s2121_s6] sm:$0xff] }
0x118c   :  { %1797 = vrcp.f32 %v1048_v18  ;;  %v1327_v18 = vld [vmem:[%s2121_s6 + $0x8] sm:$0xff] }
0x118e   :  { %1681 = vmatpush3.bf16.msra.mxu1 %v1680_v13 }
0x1195   :  { %v1796_v19 = vpop.eup %1795 }
0x1196   :  { %v1798_v22 = vpop.eup %1797  ;;  %v1061_v28 = vmul.f32 %v1796_v19, %v1057_v26 }
0x1197   :  { %v1062_v29 = vmul.f32 %v1798_v22, %v1058_v27 }
0x11f9   :  { %v1066_v21 = vpop.permute.xlu0 %1065 }
0x11fa   :  { %v1068_v23 = vpop.permute.xlu1 %1067  ;;  %v1071_v24 = vmul.f32 %v1796_v19, %v1066_v21 }
0x11fb   :  { %v1072_v25 = vmul.f32 %v1798_v22, %v1068_v23 }
0x11fc   :  { %1075 = vrot.lane.b32.xlu0 %v1071_v24, %s1846_s20 }
0x11fd   :  { %1077 = vrot.lane.b32.xlu1 %v1072_v25, %s1846_s20 }
0x126e   :  { %v1076_v30 = vpop.permute.xlu0 %1075 }
0x126f   :  { %v1078_v31 = vpop.permute.xlu1 %1077  ;;  %v1081_v32 = vadd.f32 %v1076_v30, %v1061_v28  ;;  %v1328_v28 = vld [vmem:[%s2121_s6 + $0x10] sm:$0xff]  ;;  %s1819_s6 = scalar_lea.vmem %s1419_s16, 32 }
0x1270   :  { %v1082_v33 = vadd.f32 %v1078_v31, %v1062_v29  ;;  %p1820_p0 = scmp.ne.s32.totalorder %s1419_s16, %s1819_s6  ;;  %p1825_p2 = scmp.lt.s32.totalorder %s1819_s6, %s1819_s6 }
0x1271   :  { %1799 = vtanh.f32 %v1081_v32  ;;  %v1197_v60 = vrot.slane %v1081_v32, 7 }
0x1272   :  { %1801 = vtanh.f32 %v1082_v33  ;;  %v1198_v61 = vrot.slane %v1082_v33, 7  ;;  %v1454_v33 = vld [vmem:[%s2122_s7] ss:$0 sm:$0xff]  ;;  %p1826_p3 = por %p1825_p2, %p1824_p1 }
0x1274   :  { %p1827_p4 = pnand %p1826_p3, %p1820_p0 }
0x127b   :  { %v1800_v7 = vpop.eup %1799 }
0x127c   :  { %v1802_v34 = vpop.eup %1801  ;;  %1087 = vrot.lane.b32.xlu0 %v1800_v7, %s1846_s20 }
0x127d   :  { %1089 = vrot.lane.b32.xlu1 %v1802_v34, %s1846_s20 }
0x12ee   :  { %v1088_v35 = vpop.permute.xlu0 %1087 }
0x12ef   :  { %v1090_v12 = vpop.permute.xlu1 %1089  ;;  %v1093_v36 = vmul.f32 %v1796_v19, %v1088_v35  ;;  %v1683_v19 = vpack.c.bf16 %v1327_v18, %v1326_v17 }
0x12f0   :  { %v1094_v37 = vmul.f32 %v1798_v22, %v1090_v12 }
0x12f1   :  { %v1097_v38 = vrot.slane %v1093_v36, 6 }
0x12f2   :  { %v1098_v39 = vrot.slane %v1094_v37, 5 }
0x12f4   :  { %v1099_v40 = vsel %vm260_vm2, %v1098_v39, %v1097_v38 }
0x12f5   :  { %1100 = vrot.lane.b32.xlu0 %v1099_v40, %s1847_s3 }
0x1367   :  { %v1101_v41 = vpop.permute.xlu0 %1100 }
0x1368   :  { %1602 = vmatmul.mubr.msk.f32.vlgmr.msra.gmra.mrb[8].mxu0 %vm129_vm3, %v1101_v41 }
0x1369   :  { %1621 = vmatprep.mubr.msk.f32.mxu0 %vm1844_vm1, %v1845_v10  ;;  %1684 = vmatpush3.bf16.msra.mxu0 %v1683_v19 }
0x136a   :  { %1619 = vmatprep.subr.mxu0 %v1845_v10  ;;  %v1452_v10 = vld [vmem:[%s2120_s5] ss:$0 sm:$0xff] }
0x136d   :  { %1620 = vmatpush3.msra.mxu0 %v1328_v28 }
0x143b   :  { %v1170_v42 = vpop.f32.mrb[8].mxu0 }
0x143c   :  { %v1175_v43 = vrot.slane %v1170_v42, 1  ;;  %v1176_v44 = vrot.slane %v1170_v42, 2  ;;  %v1603_v45 = vpop.f32.mrb[9].mxu0 }
0x143e   :  { %v1179_v46 = vadd.f32 %v1175_v43, %v1950_v20  ;;  %v1180_v47 = vadd.f32 %v1176_v44, %v1948_v16 }
0x1440   :  { %1803 = vtanh.f32 %v1179_v46  ;;  %v1450_v50 = vmul.f32 -1.442695, %v1179_v46  ;;  %v1451_v51 = vmul.f32 -1.442695, %v1180_v47 }
0x1441   :  { %1805 = vtanh.f32 %v1180_v47 }
0x1442   :  { %1807 = vpow2.f32 %v1450_v50 }
0x1443   :  { %1809 = vpow2.f32 %v1451_v51 }
0x144a   :  { %v1804_v48 = vpop.eup %1803 }
0x144b   :  { %v1806_v49 = vpop.eup %1805  ;;  %1205 = vrot.lane.b32.xlu1 %v1804_v48, %s1846_s20 }
0x144c   :  { %1207 = vrot.lane.b32.xlu0 %v1806_v49, %s1846_s20  ;;  %v1808_v52 = vpop.eup %1807 }
0x144d   :  { %v1810_v53 = vpop.eup %1809  ;;  %v1187_v54 = vadd.f32 1.0, %v1808_v52 }
0x144e   :  { %v1188_v55 = vadd.f32 1.0, %v1810_v53 }
0x144f   :  { %1811 = vrcp.f32 %v1187_v54 }
0x1450   :  { %1813 = vrcp.f32 %v1188_v55 }
0x1459   :  { %v1812_v20 = vpop.eup %1811 }
0x145a   :  { %v1814_v56 = vpop.eup %1813  ;;  %v1201_v62 = vmul.f32 %v1812_v20, %v1197_v60 }
0x145b   :  { %v1202_v63 = vmul.f32 %v1814_v56, %v1198_v61 }
0x14bd   :  { %v1206_v16 = vpop.permute.xlu1 %1205 }
0x14be   :  { %v1208_v57 = vpop.permute.xlu0 %1207  ;;  %v1211_v58 = vmul.f32 %v1812_v20, %v1206_v16 }
0x14bf   :  { %v1212_v59 = vmul.f32 %v1814_v56, %v1208_v57 }
0x14c0   :  { %1215 = vrot.lane.b32.xlu1 %v1211_v58, %s1846_s20 }
0x14c1   :  { %1217 = vrot.lane.b32.xlu0 %v1212_v59, %s1846_s20 }
0x1532   :  { %v1216_v0 = vpop.permute.xlu1 %1215 }
0x1533   :  { %v1218_v1 = vpop.permute.xlu0 %1217  ;;  %v1221_v2 = vadd.f32 %v1216_v0, %v1201_v62 }
0x1534   :  { %v1222_v4 = vadd.f32 %v1218_v1, %v1202_v63 }
0x1535   :  { %1815 = vtanh.f32 %v1221_v2 }
0x1536   :  { %1817 = vtanh.f32 %v1222_v4 }
0x153f   :  { %v1816_v14 = vpop.eup %1815 }
0x1540   :  { %v1818_v15 = vpop.eup %1817  ;;  %1227 = vrot.lane.b32.xlu1 %v1816_v14, %s1846_s20 }
0x1541   :  { %1229 = vrot.lane.b32.xlu0 %v1818_v15, %s1846_s20 }
0x15b2   :  { %v1228_v3 = vpop.permute.xlu1 %1227 }
0x15b3   :  { %v1230_v21 = vpop.permute.xlu0 %1229  ;;  %v1233_v22 = vmul.f32 %v1812_v20, %v1228_v3 }
0x15b4   :  { %v1234_v23 = vmul.f32 %v1814_v56, %v1230_v21 }
0x15b5   :  { %v1248_v24 = vrot.slane %v1233_v22, 7 }
0x15b6   :  { %v1249_v25 = vrot.slane %v1234_v23, 6 }
0x15b8   :  { %v1250_v26 = vsel %vm260_vm2, %v1249_v25, %v1248_v24 }
0x15b9   :  { %1251 = vrot.lane.b32.xlu1 %v1250_v26, %s1847_s3 }
0x162b   :  { %v1252_v27 = vpop.permute.xlu1 %1251 }
0x162c   :  { %1613 = vmatmul.mubr.msk.f32.vlgmr.msra.gmra.mrb[8].mxu1 %vm129_vm3, %v1252_v27 }
0x16ff   :  { %v1321_v29 = vpop.f32.mrb[8].mxu1 }
0x1700   :  { %v1322_v30 = vadd.f32 %v1452_v10, %v1321_v29  ;;  %v1614_v31 = vpop.f32.mrb[9].mxu1 }
0x1702   :  { %v1325_v32 = vmax.f32 %v1322_v30, 0.0 }
0x1704   :  { %1622 = vmatmul.mubr.msk.f32.vlgmr.msra.gmra.mrb[10].mxu0 %vm1336_vm4, %v1325_v32 }
0x17d7   :  { %v1406_v7 = vpop.f32.mrb[10].mxu0 }
0x17d8   :  { %v1407_v34 = vadd.f32 %v1454_v33, %v1406_v7  ;;  %v1623_v35 = vpop.f32.mrb[11].mxu0 }
0x17da   :  { %1411 = vst.msk [vmem:[#allocation2] sm:$0x3] %vm1410_vm5, %v1407_v34 }
0x17db   :  { %1830 = shalt.err (!%p1827_p4)
}
0x17dc   :  { %s1831_s18 = scalar_lea.hbm %s2123_s8, 32 }
0x17dd   :  { %p1832_p5 = scmp.ne.s32.totalorder %s2123_s8, %s1831_s18  ;;  %p1835_p6 = scmp.lt.u32.totalorder %s1831_s18, %s2123_s8 }
0x17df   :  { %p1837_p7 = pnand %p1835_p6, %p1832_p5 }
0x17e1   :  { %1840 = shalt.err (!%p1837_p7)
}
0x17e2   :  { %1421 = dma.vmem_to_hbm [thread:$0]  %s1419_s16, 32, %s2123_s8, [#allocation3]  }
0x17e3   :  { %1841 = dma.done.wait [#allocation3], 32  }
0x17e4   :  { %1842 = vsyncadd [#allocation3], 4294967264 }
0x17e5   :  { %1425 = vsyncpa [#allocation3], 1 }

</bundles_post_ra>
